<compile_context>
chip_gen: v5e
topology: v5e:2x2
jax: 0.10.0
libtpu: 0.0.40
codegen_flags: <defaults>
</compile_context>

<pallas_src>
import functools

import numpy as np
import jax
import jax.numpy as jnp
from jax.experimental import pallas as pl
from jax.experimental.pallas import tpu as pltpu


_LANE_TILE_MAX = 2048                      # lane-tile upper bound (multiple of 128)
_FUSED_VMEM_BUDGET = 48 * 1024 * 1024      # conservative vs v7x's 64 MiB physical VMEM


# --------------------- Fused kernel: deconv matmul + BN stats + BN affine + ReLU ---------------------

def _fused_deconv_bn_relu_kernel(xt_ref, w_ref, gamma_ref, beta_ref, out_ref,
                                 ybuf, rowsum, rowsq, scale4, shift4,
                                 *, inv_count, eps, s2, C):
    """xt_ref  : (T*C, LT)   shared shifted-tap columns for this lane tile (bf16 or f32).
       w_ref   : (s^2*C, T*C) parity-class channel-mixing matrix.
       gamma/beta: (C, 1)    BatchNorm affine parameters (f32).
       out_ref : (s^2*C, LT) normalized + ReLU'd activations, row = parity_class*C + channel.
       ybuf    : (n_tiles, s^2*C, LT) VMEM scratch, conv output resident across both phases."""
    ph = pl.program_id(0)    # 0: matmul + merged sum / sum-of-squares, 1: BN affine + ReLU
    t = pl.program_id(1)     # lane tile (batch x sub-grid pixels)

    # ---- phase 0: one MXU matmul per lane tile; stats fused into the same pass ----
    @pl.when(ph == 0)
    def _():
        @pl.when(t == 0)
        def _():
            rowsum[...] = jnp.zeros_like(rowsum)
            rowsq[...] = jnp.zeros_like(rowsq)

        y = jnp.dot(w_ref[...], xt_ref[...],
                    preferred_element_type=jnp.float32)       # (s^2*C, LT), f32 accum
        ybuf[t] = y
        rowsum[...] += jnp.sum(y, axis=1, keepdims=True)      # zero-padded lanes add 0
        rowsq[...] += jnp.sum(y * y, axis=1, keepdims=True)

    # ---- phase 1: fused BatchNorm affine + ReLU, lane-dense store straight to HBM ----
    @pl.when(ph == 1)
    def _():
        @pl.when(t == 0)
        def _():
            # Fold the s^2 parity-class rows of every channel (static, tile-aligned slices).
            ch_sum = rowsum[0:C, :]
            ch_sq = rowsq[0:C, :]
            for p in range(1, s2):
                ch_sum = ch_sum + rowsum[p * C:(p + 1) * C, :]
                ch_sq = ch_sq + rowsq[p * C:(p + 1) * C, :]
            mean = ch_sum * inv_count
            var = ch_sq * inv_count - mean * mean             # biased, as in torch training
            sc = gamma_ref[...] * jax.lax.rsqrt(var + eps)
            sh = beta_ref[...] - mean * sc
            scale4[...] = jnp.concatenate([sc] * s2, axis=0)  # replicate per parity class
            shift4[...] = jnp.concatenate([sh] * s2, axis=0)

        out_ref[...] = jnp.maximum(ybuf[t] * scale4[...] + shift4[...],
                                   0.0).astype(out_ref.dtype)


def _fused_call(xt, w4, gamma_c1, beta_c1, *, s2, C, n_tiles, LT, inv_count, eps, vmem_limit):
    TC = xt.shape[0]
    S2C = s2 * C
    kernel = functools.partial(_fused_deconv_bn_relu_kernel,
                               inv_count=inv_count, eps=eps, s2=s2, C=C)

    return pl.pallas_call(
        kernel,
        out_shape=jax.ShapeDtypeStruct((S2C, n_tiles * LT), jnp.float32),
        grid_spec=pltpu.PrefetchScalarGridSpec(
            num_scalar_prefetch=0,
            grid=(2, n_tiles),
            in_specs=[
                # Stream lane tiles only during phase 0; park on the last tile afterwards so
                # phase 1 (which only reads the VMEM-resident ybuf) triggers no refetch.
                pl.BlockSpec((TC, LT),
                             lambda ph, t: (0, jnp.where(ph == 0, t, n_tiles - 1))),
                pl.BlockSpec((S2C, TC), lambda ph, t: (0, 0)),
                pl.BlockSpec((C, 1), lambda ph, t: (0, 0)),
                pl.BlockSpec((C, 1), lambda ph, t: (0, 0)),
            ],
            # Output block only advances during phase 1; it is fully written at (ph=1, t)
            # before its index ever changes, so uninitialized VMEM never reaches HBM.
            out_specs=pl.BlockSpec((S2C, LT),
                                   lambda ph, t: (0, jnp.where(ph == 1, t, 0))),
            scratch_shapes=[
                pltpu.VMEM((n_tiles, S2C, LT), jnp.float32),  # conv activations (resident)
                pltpu.VMEM((S2C, 1), jnp.float32),            # per-row sum
                pltpu.VMEM((S2C, 1), jnp.float32),            # per-row sum of squares
                pltpu.VMEM((S2C, 1), jnp.float32),            # fused BN scale per row
                pltpu.VMEM((S2C, 1), jnp.float32),            # fused BN shift per row
            ],
        ),
        compiler_params=pltpu.CompilerParams(
            # Stats accumulate across tiles and phases are ordered -> sequential grid.
            # TODO(synk): per-core partial stats + combine to expose a "parallel" axis (v7x).
            dimension_semantics=("arbitrary", "arbitrary"),
            vmem_limit_bytes=vmem_limit,
        ),
    )(xt, w4, gamma_c1, beta_c1)


# --------------------------------- Wrapper (layout plumbing in JAX) ---------------------------------

def _round_up(v, m):
    return (v + m - 1) // m * m


def deconv_forward(x_nchw, w_t, gamma, beta, *, stride, padding, output_padding,
                   eps=1e-5, mxu_dtype=jnp.bfloat16):
    """ConvTranspose2d(C->C, K, stride, padding, output_padding, bias=False)
       -> BatchNorm2d(C) (training-mode batch statistics) -> ReLU.
       x_nchw: (N, C, H, W); w_t: ConvTranspose2d weight (C_in, C_out, K, K), C_in == C_out."""
    N, C, H, W = x_nchw.shape
    K = w_t.shape[2]
    assert w_t.shape[0] == C and w_t.shape[1] == C
    s = int(stride)
    HO = (H - 1) * s - 2 * padding + K + output_padding
    WO = (W - 1) * s - 2 * padding + K + output_padding
    assert HO > 0 and WO > 0
    # TODO(synk): support HO/WO not divisible by stride (ragged last parity classes).
    assert HO % s == 0 and WO % s == 0, "parity decomposition needs stride | output size"
    A, B = HO // s, WO // s
    s2 = s * s

    # ---- static tap analysis: output parity q uses kernel tap ky at input-row offset dy ----
    taps = []
    for q in range(s):
        taps.append([(ky, (q + padding - ky) // s)
                     for ky in range(K) if (q + padding - ky) % s == 0])
    offs = sorted({dy for lst in taps for _, dy in lst})
    T1 = len(offs)
    T = T1 * T1
    off_idx = {d: i for i, d in enumerate(offs)}
    d_min, d_max = offs[0], offs[-1]
    pt = max(0, -d_min)
    pby = max(0, (A - 1 + d_max) - (H - 1))
    pbx = max(0, (B - 1 + d_max) - (W - 1))

    x = x_nchw.astype(jnp.float32)
    xpad = jnp.pad(x, ((0, 0), (0, 0), (pt, pby), (pt, pbx)))

    # Shared shifted-tap columns: all stride^2 sub-convolutions read the same T taps, so this
    # is the only expanded tensor and it is ~(K^2/T)x smaller than a dense transposed im2col
    # (and carries no interior-dilation zeros).
    # TODO(synk): build these columns in-kernel from a VMEM-resident xpad block to remove the
    #             remaining T-fold HBM expansion of the input stream entirely.
    cols = [xpad[:, :, dy + pt:dy + pt + A, dx + pt:dx + pt + B]
            for dy in offs for dx in offs]                          # each (N, C, A, B)
    xt = jnp.stack(cols, axis=1).reshape(N, T * C, A * B)
    xt = jnp.transpose(xt, (1, 0, 2)).reshape(T * C, N * A * B)     # batch folded into lanes

    L = N * A * B
    LT = _round_up(L, 128) if L <= _LANE_TILE_MAX else _LANE_TILE_MAX
    Lp = _round_up(L, LT)
    n_tiles = Lp // LT
    if Lp != L:
        xt = jnp.pad(xt, ((0, 0), (0, Lp - L)))                     # zero lanes: stats-neutral
    xt = xt.astype(mxu_dtype)

    # ---- per-parity-class weight blocks assembled into one (s^2*C, T*C) matrix ----
    w = w_t.astype(jnp.float32)
    w4 = jnp.zeros((s2 * C, T * C), jnp.float32)
    for qy in range(s):
        for qx in range(s):
            row0 = (qy * s + qx) * C
            for ky, dy in taps[qy]:
                for kx, dx in taps[qx]:
                    col0 = (off_idx[dy] * T1 + off_idx[dx]) * C
                    w4 = w4.at[row0:row0 + C, col0:col0 + C].set(w[:, :, ky, kx].T)
    w4 = w4.astype(mxu_dtype)

    # ---- VMEM accounting for the fused (activations-resident) path ----
    in_bytes = jnp.dtype(mxu_dtype).itemsize
    vmem_need = (n_tiles * s2 * C * LT * 4               # ybuf (f32), resident both phases
                 + 2 * T * C * LT * in_bytes             # double-buffered input lane tiles
                 + 2 * s2 * C * LT * 4                   # double-buffered output lane tiles
                 + 2 * s2 * C * max(T * C, 128) * in_bytes   # weight block (lane-padded)
                 + 8 * s2 * C * 128 * 4)                 # small per-row scratch / params
    assert vmem_need <= _FUSED_VMEM_BUDGET, \
        "activations too large for the VMEM-resident fused path"  # TODO(synk): tiled fallback

    out = _fused_call(xt, w4,
                      gamma.astype(jnp.float32).reshape(C, 1),
                      beta.astype(jnp.float32).reshape(C, 1),
                      s2=s2, C=C, n_tiles=n_tiles, LT=LT,
                      inv_count=1.0 / float(N * HO * WO), eps=eps,
                      vmem_limit=_FUSED_VMEM_BUDGET)

    # Un-interleave the parity classes (tiny output; pure layout plumbing).
    y = out[:, :L].reshape(s, s, C, N, A, B)
    return jnp.transpose(y, (3, 2, 4, 0, 5, 1)).reshape(N, C, HO, WO)


# ----------------------- Reference (pure numpy, scatter form of ConvTranspose) -----------------------

def _reference(x, w_t, gamma, beta, stride, padding, output_padding, eps=1e-5):
    x = np.asarray(x, np.float64)
    w = np.asarray(w_t, np.float64)
    N, Ci, H, W = x.shape
    Co, K = w.shape[1], w.shape[2]
    HO = (H - 1) * stride - 2 * padding + K + output_padding
    WO = (W - 1) * stride - 2 * padding + K + output_padding
    out = np.zeros((N, Co, HO, WO), np.float64)
    for iy in range(H):
        for ix in range(W):
            for ky in range(K):
                for kx in range(K):
                    oy = iy * stride - padding + ky
                    ox = ix * stride - padding + kx
                    if 0 <= oy < HO and 0 <= ox < WO:
                        out[:, :, oy, ox] += x[:, :, iy, ix] @ w[:, :, ky, kx]
    mean = out.mean(axis=(0, 2, 3))
    var = out.var(axis=(0, 2, 3))  # biased, as in PyTorch's training-mode forward
    norm = (out - mean[None, :, None, None]) / np.sqrt(var[None, :, None, None] + eps)
    y = norm * np.asarray(gamma, np.float64)[None, :, None, None] + \
        np.asarray(beta, np.float64)[None, :, None, None]
    return np.maximum(y, 0.0)


# ----------------------------------------------- Main -----------------------------------------------

if __name__ == "__main__":
    # DeConv(in_planes=8, out_planes=8, kernel_size=3, stride=2, padding=1, output_padding=1)
    N, C, H, W = 2, 8, 8, 8
    K, stride, padding, output_padding = 3, 2, 1, 1

    key = jax.random.PRNGKey(0)
    k_x, k_w, k_g, k_b = jax.random.split(key, 4)
    x = jax.random.normal(k_x, (N, C, H, W), jnp.float32)
    # ConvTranspose2d weight shape: (in_channels, out_channels, K, K); here in == out == C.
    w_t = jax.random.normal(k_w, (C, C, K, K), jnp.float32) * 0.1
    gamma = 0.5 + jax.random.uniform(k_g, (C,), jnp.float32)
    beta = jax.random.normal(k_b, (C,), jnp.float32) * 0.1

    ref = _reference(np.asarray(x), np.asarray(w_t), np.asarray(gamma), np.asarray(beta),
                     stride, padding, output_padding)

    # f32 MXU path: strict numerical parity with the PyTorch reference.
    out_f32 = jax.block_until_ready(
        deconv_forward(x, w_t, gamma, beta, stride=stride, padding=padding,
                       output_padding=output_padding, mxu_dtype=jnp.float32))
    np.testing.assert_allclose(np.asarray(out_f32), ref, rtol=1e-3, atol=1e-3)

    # bf16 MXU path (default/perf path: ~2x MXU throughput, half the column-stream bytes);
    # accumulation stays f32, BN/ReLU math stays f32 — tolerance reflects bf16 input rounding.
    out_bf16 = jax.block_until_ready(
        deconv_forward(x, w_t, gamma, beta, stride=stride, padding=padding,
                       output_padding=output_padding, mxu_dtype=jnp.bfloat16))
    np.testing.assert_allclose(np.asarray(out_bf16), ref, rtol=2e-2, atol=2e-2)

    print("KERNEL_OK")
</pallas_src>

<mosaic_0001>
module attributes {stable_mosaic.version = 11 : i64} {
  func.func @_fused_deconv_bn_relu_kernel(%arg0: i32, %arg1: i32, %arg2: memref<32x128xf32, #tpu.memory_space<vmem>>, %arg3: memref<32x32xf32, #tpu.memory_space<vmem>>, %arg4: memref<8x1xf32, #tpu.memory_space<vmem>>, %arg5: memref<8x1xf32, #tpu.memory_space<vmem>>, %arg6: memref<32x128xf32, #tpu.memory_space<vmem>>, %arg7: memref<1x32x128xf32, #tpu.memory_space<vmem>>, %arg8: memref<32x1xf32, #tpu.memory_space<vmem>>, %arg9: memref<32x1xf32, #tpu.memory_space<vmem>>, %arg10: memref<32x1xf32, #tpu.memory_space<vmem>>, %arg11: memref<32x1xf32, #tpu.memory_space<vmem>>) attributes {dimension_semantics = [#tpu.dimension_semantics<arbitrary>, #tpu.dimension_semantics<arbitrary>], iteration_bounds = array<i64: 2, 1>, scalar_prefetch = 0 : i64, scratch_operands = 5 : i64, tpu.core_type = #tpu.core_type<tc>, window_params = [{transform_indices = @transform_0, window_bounds = array<i64: 32, 128>}, {pipeline_mode = #tpu.pipeline_mode<synchronous>, transform_indices = @transform_1, window_bounds = array<i64: 32, 32>}, {pipeline_mode = #tpu.pipeline_mode<synchronous>, transform_indices = @transform_2, window_bounds = array<i64: 8, 1>}, {pipeline_mode = #tpu.pipeline_mode<synchronous>, transform_indices = @transform_3, window_bounds = array<i64: 8, 1>}, {transform_indices = @transform_4, window_bounds = array<i64: 32, 128>}]} {
    %c0_i32 = arith.constant 0 : i32
    %0 = arith.cmpi eq, %arg0, %c0_i32 : i32
    %1 = arith.extui %0 : i1 to i32
    %c0_i32_0 = arith.constant 0 : i32
    %2 = arith.cmpi ne, %1, %c0_i32_0 : i32
    scf.if %2 {
      %c0_i32_2 = arith.constant 0 : i32
      %6 = arith.cmpi eq, %arg1, %c0_i32_2 : i32
      %7 = arith.extui %6 : i1 to i32
      %c0_i32_3 = arith.constant 0 : i32
      %8 = arith.cmpi ne, %7, %c0_i32_3 : i32
      scf.if %8 {
        %cst_19 = arith.constant 0.000000e+00 : f32
        %27 = vector.broadcast %cst_19 : f32 to vector<32x1xf32>
        %c0_20 = arith.constant 0 : index
        %c0_21 = arith.constant 0 : index
        %28 = vector.load %arg8[%c0_20, %c0_21] : memref<32x1xf32, #tpu.memory_space<vmem>>, vector<32x1xf32>
        tpu.vector_store %arg8[%c0_20, %c0_21], %27 {strides = array<i32>} : memref<32x1xf32, #tpu.memory_space<vmem>>, vector<32x1xf32>,
        %cst_22 = arith.constant 0.000000e+00 : f32
        %29 = vector.broadcast %cst_22 : f32 to vector<32x1xf32>
        %c0_23 = arith.constant 0 : index
        %c0_24 = arith.constant 0 : index
        %30 = vector.load %arg9[%c0_23, %c0_24] : memref<32x1xf32, #tpu.memory_space<vmem>>, vector<32x1xf32>
        tpu.vector_store %arg9[%c0_23, %c0_24], %29 {strides = array<i32>} : memref<32x1xf32, #tpu.memory_space<vmem>>, vector<32x1xf32>,
      } else {
      }
      %c0 = arith.constant 0 : index
      %c0_4 = arith.constant 0 : index
      %9 = vector.load %arg3[%c0, %c0_4] : memref<32x32xf32, #tpu.memory_space<vmem>>, vector<32x32xf32>
      %c0_5 = arith.constant 0 : index
      %c0_6 = arith.constant 0 : index
      %10 = vector.load %arg2[%c0_5, %c0_6] : memref<32x128xf32, #tpu.memory_space<vmem>>, vector<32x128xf32>
      %cst = arith.constant dense<0.000000e+00> : vector<32x128xf32>
      %11 = tpu.matmul %9, %10, %cst {dimension_numbers = #tpu.dot_dimension_numbers<[1], [0], [0], [1], [0, 0, 1, 1], [], []>} : vector<32x32xf32>, vector<32x128xf32>, vector<32x128xf32> -> vector<32x128xf32>
      %12 = arith.index_cast %arg1 : i32 to index
      %c0_7 = arith.constant 0 : index
      %c0_8 = arith.constant 0 : index
      %13 = vector.load %arg7[%12, %c0_7, %c0_8] : memref<1x32x128xf32, #tpu.memory_space<vmem>>, vector<1x32x128xf32>
      %14 = vector.shape_cast %13 : vector<1x32x128xf32> to vector<32x128xf32>
      %15 = vector.shape_cast %11 : vector<32x128xf32> to vector<1x32x128xf32>
      tpu.vector_store %arg7[%12, %c0_7, %c0_8], %15 {strides = array<i32>} : memref<1x32x128xf32, #tpu.memory_space<vmem>>, vector<1x32x128xf32>,
      %c0_9 = arith.constant 0 : index
      %c0_10 = arith.constant 0 : index
      %16 = vector.load %arg8[%c0_9, %c0_10] : memref<32x1xf32, #tpu.memory_space<vmem>>, vector<32x1xf32>
      %cst_11 = arith.constant dense<0.000000e+00> : vector<32xf32>
      %17 = vector.multi_reduction <add>, %11, %cst_11 [1] : vector<32x128xf32> to vector<32xf32>
      %18 = vector.shape_cast %17 : vector<32xf32> to vector<32x1xf32>
      %19 = arith.addf %16, %18 : vector<32x1xf32>
      %c0_12 = arith.constant 0 : index
      %c0_13 = arith.constant 0 : index
      %20 = vector.load %arg8[%c0_12, %c0_13] : memref<32x1xf32, #tpu.memory_space<vmem>>, vector<32x1xf32>
      tpu.vector_store %arg8[%c0_12, %c0_13], %19 {strides = array<i32>} : memref<32x1xf32, #tpu.memory_space<vmem>>, vector<32x1xf32>,
      %c0_14 = arith.constant 0 : index
      %c0_15 = arith.constant 0 : index
      %21 = vector.load %arg9[%c0_14, %c0_15] : memref<32x1xf32, #tpu.memory_space<vmem>>, vector<32x1xf32>
      %22 = arith.mulf %11, %11 : vector<32x128xf32>
      %cst_16 = arith.constant dense<0.000000e+00> : vector<32xf32>
      %23 = vector.multi_reduction <add>, %22, %cst_16 [1] : vector<32x128xf32> to vector<32xf32>
      %24 = vector.shape_cast %23 : vector<32xf32> to vector<32x1xf32>
      %25 = arith.addf %21, %24 : vector<32x1xf32>
      %c0_17 = arith.constant 0 : index
      %c0_18 = arith.constant 0 : index
      %26 = vector.load %arg9[%c0_17, %c0_18] : memref<32x1xf32, #tpu.memory_space<vmem>>, vector<32x1xf32>
      tpu.vector_store %arg9[%c0_17, %c0_18], %25 {strides = array<i32>} : memref<32x1xf32, #tpu.memory_space<vmem>>, vector<32x1xf32>,
    } else {
    }
    %c1_i32 = arith.constant 1 : i32
    %3 = arith.cmpi eq, %arg0, %c1_i32 : i32
    %4 = arith.extui %3 : i1 to i32
    %c0_i32_1 = arith.constant 0 : i32
    %5 = arith.cmpi ne, %4, %c0_i32_1 : i32
    scf.if %5 {
      %c0_i32_2 = arith.constant 0 : i32
      %6 = arith.cmpi eq, %arg1, %c0_i32_2 : i32
      %7 = arith.extui %6 : i1 to i32
      %c0_i32_3 = arith.constant 0 : i32
      %8 = arith.cmpi ne, %7, %c0_i32_3 : i32
      scf.if %8 {
        %c0_11 = arith.constant 0 : index
        %c0_12 = arith.constant 0 : index
        %21 = vector.load %arg8[%c0_11, %c0_12] : memref<32x1xf32, #tpu.memory_space<vmem>>, vector<8x1xf32>
        %c0_13 = arith.constant 0 : index
        %c0_14 = arith.constant 0 : index
        %22 = vector.load %arg9[%c0_13, %c0_14] : memref<32x1xf32, #tpu.memory_space<vmem>>, vector<8x1xf32>
        %c8 = arith.constant 8 : index
        %c0_15 = arith.constant 0 : index
        %23 = vector.load %arg8[%c8, %c0_15] : memref<32x1xf32, #tpu.memory_space<vmem>>, vector<8x1xf32>
        %24 = arith.addf %21, %23 : vector<8x1xf32>
        %c8_16 = arith.constant 8 : index
        %c0_17 = arith.constant 0 : index
        %25 = vector.load %arg9[%c8_16, %c0_17] : memref<32x1xf32, #tpu.memory_space<vmem>>, vector<8x1xf32>
        %26 = arith.addf %22, %25 : vector<8x1xf32>
        %c16 = arith.constant 16 : index
        %c0_18 = arith.constant 0 : index
        %27 = vector.load %arg8[%c16, %c0_18] : memref<32x1xf32, #tpu.memory_space<vmem>>, vector<8x1xf32>
        %28 = arith.addf %24, %27 : vector<8x1xf32>
        %c16_19 = arith.constant 16 : index
        %c0_20 = arith.constant 0 : index
        %29 = vector.load %arg9[%c16_19, %c0_20] : memref<32x1xf32, #tpu.memory_space<vmem>>, vector<8x1xf32>
        %30 = arith.addf %26, %29 : vector<8x1xf32>
        %c24 = arith.constant 24 : index
        %c0_21 = arith.constant 0 : index
        %31 = vector.load %arg8[%c24, %c0_21] : memref<32x1xf32, #tpu.memory_space<vmem>>, vector<8x1xf32>
        %32 = arith.addf %28, %31 : vector<8x1xf32>
        %c24_22 = arith.constant 24 : index
        %c0_23 = arith.constant 0 : index
        %33 = vector.load %arg9[%c24_22, %c0_23] : memref<32x1xf32, #tpu.memory_space<vmem>>, vector<8x1xf32>
        %34 = arith.addf %30, %33 : vector<8x1xf32>
        %cst_24 = arith.constant 0.001953125 : f32
        %35 = vector.broadcast %cst_24 : f32 to vector<8x1xf32>
        %36 = arith.mulf %32, %35 : vector<8x1xf32>
        %cst_25 = arith.constant 0.001953125 : f32
        %37 = vector.broadcast %cst_25 : f32 to vector<8x1xf32>
        %38 = arith.mulf %34, %37 : vector<8x1xf32>
        %39 = arith.mulf %36, %36 : vector<8x1xf32>
        %40 = arith.subf %38, %39 : vector<8x1xf32>
        %c0_26 = arith.constant 0 : index
        %c0_27 = arith.constant 0 : index
        %41 = vector.load %arg4[%c0_26, %c0_27] : memref<8x1xf32, #tpu.memory_space<vmem>>, vector<8x1xf32>
        %cst_28 = arith.constant 9.99999974E-6 : f32
        %42 = vector.broadcast %cst_28 : f32 to vector<8x1xf32>
        %43 = arith.addf %40, %42 : vector<8x1xf32>
        %44 = math.rsqrt %43 : vector<8x1xf32>
        %45 = arith.mulf %41, %44 : vector<8x1xf32>
        %c0_29 = arith.constant 0 : index
        %c0_30 = arith.constant 0 : index
        %46 = vector.load %arg5[%c0_29, %c0_30] : memref<8x1xf32, #tpu.memory_space<vmem>>, vector<8x1xf32>
        %47 = arith.mulf %36, %45 : vector<8x1xf32>
        %48 = arith.subf %46, %47 : vector<8x1xf32>
        %49 = tpu.concatenate %45, %45, %45, %45 in 0 : vector<8x1xf32>, vector<8x1xf32>, vector<8x1xf32>, vector<8x1xf32> -> vector<32x1xf32>
        %c0_31 = arith.constant 0 : index
        %c0_32 = arith.constant 0 : index
        %50 = vector.load %arg10[%c0_31, %c0_32] : memref<32x1xf32, #tpu.memory_space<vmem>>, vector<32x1xf32>
        tpu.vector_store %arg10[%c0_31, %c0_32], %49 {strides = array<i32>} : memref<32x1xf32, #tpu.memory_space<vmem>>, vector<32x1xf32>,
        %51 = tpu.concatenate %48, %48, %48, %48 in 0 : vector<8x1xf32>, vector<8x1xf32>, vector<8x1xf32>, vector<8x1xf32> -> vector<32x1xf32>
        %c0_33 = arith.constant 0 : index
        %c0_34 = arith.constant 0 : index
        %52 = vector.load %arg11[%c0_33, %c0_34] : memref<32x1xf32, #tpu.memory_space<vmem>>, vector<32x1xf32>
        tpu.vector_store %arg11[%c0_33, %c0_34], %51 {strides = array<i32>} : memref<32x1xf32, #tpu.memory_space<vmem>>, vector<32x1xf32>,
      } else {
      }
      %9 = arith.index_cast %arg1 : i32 to index
      %c0 = arith.constant 0 : index
      %c0_4 = arith.constant 0 : index
      %10 = vector.load %arg7[%9, %c0, %c0_4] : memref<1x32x128xf32, #tpu.memory_space<vmem>>, vector<1x32x128xf32>
      %11 = vector.shape_cast %10 : vector<1x32x128xf32> to vector<32x128xf32>
      %c0_5 = arith.constant 0 : index
      %c0_6 = arith.constant 0 : index
      %12 = vector.load %arg10[%c0_5, %c0_6] : memref<32x1xf32, #tpu.memory_space<vmem>>, vector<32x1xf32>
      %13 = vector.broadcast %12 : vector<32x1xf32> to vector<32x128xf32>
      %14 = arith.mulf %11, %13 : vector<32x128xf32>
      %c0_7 = arith.constant 0 : index
      %c0_8 = arith.constant 0 : index
      %15 = vector.load %arg11[%c0_7, %c0_8] : memref<32x1xf32, #tpu.memory_space<vmem>>, vector<32x1xf32>
      %16 = vector.broadcast %15 : vector<32x1xf32> to vector<32x128xf32>
      %17 = arith.addf %14, %16 : vector<32x128xf32>
      %cst = arith.constant 0.000000e+00 : f32
      %18 = vector.broadcast %cst : f32 to vector<32x128xf32>
      %19 = arith.maximumf %17, %18 : vector<32x128xf32>
      %c0_9 = arith.constant 0 : index
      %c0_10 = arith.constant 0 : index
      %20 = vector.load %arg6[%c0_9, %c0_10] : memref<32x128xf32, #tpu.memory_space<vmem>>, vector<32x128xf32>
      tpu.vector_store %arg6[%c0_9, %c0_10], %19 {strides = array<i32>} : memref<32x128xf32, #tpu.memory_space<vmem>>, vector<32x128xf32>,
    } else {
    }
    return
  }
  func.func @transform_0(%arg0: i32, %arg1: i32) -> (i32, i32) {
    %c0_i32 = arith.constant 0 : i32
    %0 = arith.cmpi eq, %arg0, %c0_i32 : i32
    %c0_i32_0 = arith.constant 0 : i32
    %1 = arith.select %0, %arg1, %c0_i32_0 : i32
    %c0_i32_1 = arith.constant 0 : i32
    %c0_i32_2 = arith.constant 0 : i32
    return %c0_i32_1, %1 : i32, i32
  }
  func.func @transform_1(%arg0: i32, %arg1: i32) -> (i32, i32) {
    %c0_i32 = arith.constant 0 : i32
    %c0_i32_0 = arith.constant 0 : i32
    %c0_i32_1 = arith.constant 0 : i32
    return %c0_i32, %c0_i32_0 : i32, i32
  }
  func.func @transform_2(%arg0: i32, %arg1: i32) -> (i32, i32) {
    %c0_i32 = arith.constant 0 : i32
    %c0_i32_0 = arith.constant 0 : i32
    %c0_i32_1 = arith.constant 0 : i32
    return %c0_i32, %c0_i32_0 : i32, i32
  }
  func.func @transform_3(%arg0: i32, %arg1: i32) -> (i32, i32) {
    %c0_i32 = arith.constant 0 : i32
    %c0_i32_0 = arith.constant 0 : i32
    %c0_i32_1 = arith.constant 0 : i32
    return %c0_i32, %c0_i32_0 : i32, i32
  }
  func.func @transform_4(%arg0: i32, %arg1: i32) -> (i32, i32) {
    %c1_i32 = arith.constant 1 : i32
    %0 = arith.cmpi eq, %arg0, %c1_i32 : i32
    %c0_i32 = arith.constant 0 : i32
    %1 = arith.select %0, %arg1, %c0_i32 : i32
    %c0_i32_0 = arith.constant 0 : i32
    %c0_i32_1 = arith.constant 0 : i32
    return %c0_i32_0, %1 : i32, i32
  }
}

</mosaic_0001>

<bundles_post_ra>
// kernel: tpu_custom_call.1
= control target key start
LH: loop header
LB: loop body
LE: loop exit
PB: predicated region body
PF: predicated region fallthrough
CT: control target
= control target key end

     0   :  { %9 = vsyncpa [#allocation8], 0  ;;  %s967_s0 = inlined_call_operand.hbm [shape: f32[32,128], index: 0, kind: input, shape index: {}]   ;;  %s968_s1 = inlined_call_operand.hbm [shape: f32[32,32], index: 1, kind: input, shape index: {}]   ;;  %s969_s2 = inlined_call_operand.vmem [shape: f32[8,1], index: 2, kind: input, shape index: {}]   ;;  %s970_s3 = inlined_call_operand.vmem [shape: f32[8,1], index: 3, kind: input, shape index: {}]   ;;  %s971_s4 = inlined_call_operand.hbm [shape: f32[32,128], index: 4, kind: output, shape index: {}]  }
   0x1   :  { %11 = vsyncpa [#allocation8 + $0x1], 0 }
   0x2   :  { %12 = vsyncpa [#allocation11], 0 }
   0x3   :  { %13 = vsyncpa [#allocation9], 0 }
   0x4   :  { %15 = vsyncpa [#allocation9 + $0x1], 0  ;;  %s870_s15 = smov 0   ;;  %s872_s16 = smov 0  }
   0x5   :  { %s874_s17 = smov 0  }
   0x6 LB: > { %s611_s18 = sadd.s32 4294967295, %s834_s17   ;;  %s612_s19 = sadd.s32 4294967294, %s834_s17   ;;  %s834_s17 = sphi %s874_s17, %s21_s17   ;;  %s830_s16 = sphi %s872_s16, %s975_s16   ;;  %s826_s15 = sphi %s870_s15, %s974_s15  }
   0x7   : > { %s33_s20 = sadd.s32 1, %s830_s16  ;;  %p613_p0 = scmp.ge.s32.totalorder %s834_s17, 1 }
   0x8   : > { %p35_p1 = scmp.ge.s32.totalorder %s33_s20, 2  ;;  %p161_p2 = scmp.lt.s32.totalorder %s834_s17, 3 }
   0x9   : > { %p892_p3 = scmp.eq.s32.totalorder %s611_s18, 0  ;;  %s172_s25 = sshll.u32 %s968_s1, 4  ;;  %s173_s25 = int_to_ptr.hbm [resolvable:$true] %s172_s25 }
   0xa   : > { %s977_s20 = smov (%p35_p1, %s33_s20), 0  ;;  %p898_p4 = pnand %p613_p0, %p161_p2 }
   0xb   : > { %s836_s26 = smov [#allocation10]   ;;  %p615_p7 = scmp.ge.s32.totalorder %s834_s17, 2 }
   0xc   : > { %p654_p5 = pneg %p898_p4  ;;  %s174_s27 = sshll.u32 %s836_s26, 4  ;;  %s175_s27 = int_to_ptr.vmem [resolvable:$true] %s174_s27 }
   0xd   : > { %p667_p8 = scmp.lt.s32.totalorder %s834_s17, 2  ;;  %s837_s28 = smov 128  }
   0xe   : > { %p655_p6 = pnand %p892_p3, %p654_p5  ;;  %s838_s29 = smov 8  }
   0xf   : > { %p668_p9 = scmp.eq.s32.totalorder %s834_s17, 0  ;;  %s205_s6 = sshll.u32 %s967_s0, 4  ;;  %s206_s6 = int_to_ptr.hbm [resolvable:$true] %s205_s6 }
  0x10   : > { %657 = dma.hbm_to_vmem [thread:$0]  (!%p655_p6), %s173_s25, 512, %s175_s27, [#allocation11], %s837_s28, %s837_s28, %s838_s29  }
  0x11   : > { %s839_s7 = smov [#allocation7]   ;;  %p659_p10 = pnand %p668_p9, %p667_p8 }
  0x12   : > { %s207_s8 = sshll.u32 %s839_s7, 4  ;;  %219 = sbr.rel (%p898_p4) target bundleno = 499 (0x1f3), region = 36  ;;  %s208_s8 = int_to_ptr.vmem [resolvable:$true] %s207_s8 }
  0x13   : > { %661 = dma.hbm_to_vmem [thread:$0]  (!%p659_p10), %s206_s6, 512, %s208_s8, [#allocation8], %s837_s28, %s837_s28, %s838_s29  }
  0x17   : > { %813 = dma.done.wait (%p892_p3), [#allocation8], 512  }
  0x18   : > { %815 = vsyncadd (%p892_p3), [#allocation8], 4294966784 }
  0x19   : > { %817 = dma.done.wait (%p892_p3), [#allocation11], 512  }
  0x1a   : > { %819 = vsyncadd (%p892_p3), [#allocation11], 4294966784  ;;  %p620_p11 = scmp.ne.s32.totalorder %s826_s15, 0 }
  0x1c   : > { %263 = sbr.rel (%p620_p11) target bundleno = 308 (0x134), region = 48 }
  0x21   : > { %v284_v0 = vld [vmem:[#allocation7 + $0x18] sm:$0xff]  ;;  %v283_v1 = vld [vmem:[#allocation7 + $0x10] sm:$0xff]  ;;  %v282_v2 = vld [vmem:[#allocation7 + $0x8] sm:$0xff]  ;;  %vm285_vm0 = vcmask 261120   ;;  %vm268_vm1 = vcmask 7168   ;;  %v840_v16 = vmov 0.0  }
  0x22   : > { %310 = vmatpush.msra.mxu0 %v284_v0  ;;  %631 = vmatpush.msra.mxu2 %v284_v0  ;;  %v281_v3 = vld [vmem:[#allocation7] sm:$0xff]  ;;  %v279_v5 = vld [vmem:[#allocation10 + $0x10] sm:$0xff]  ;;  %v278_v6 = vld [vmem:[#allocation10 + $0x8] sm:$0xff]  ;;  %269 = vst.msk [vmem:[#allocation3] sm:$0xff] %vm268_vm1, %v840_v16 }
  0x23   : > { %630 = vmatpush.msra.mxu1 %v284_v0  ;;  %632 = vmatpush.msra.mxu3 %v284_v0  ;;  %v277_v4 = vld [vmem:[#allocation10] sm:$0xff]  ;;  %v280_v7 = vld [vmem:[#allocation10 + $0x18] sm:$0xff]  ;;  %270 = vst.msk [vmem:[#allocation3 + $0x8] sm:$0xff] %vm268_vm1, %v840_v16 }
  0x24   : > { %311 = vmatpush.msra.mxu0 %v283_v1  ;;  %634 = vmatpush.msra.mxu2 %v283_v1  ;;  %271 = vst.msk [vmem:[#allocation3 + $0x10] sm:$0xff] %vm268_vm1, %v840_v16 }
  0x25   : > { %633 = vmatpush.msra.mxu1 %v283_v1  ;;  %635 = vmatpush.msra.mxu3 %v283_v1  ;;  %272 = vst.msk [vmem:[#allocation3 + $0x18] sm:$0xff] %vm268_vm1, %v840_v16 }
  0x26   : > { %312 = vmatpush.msra.mxu0 %v282_v2  ;;  %637 = vmatpush.msra.mxu2 %v282_v2  ;;  %273 = vst.msk [vmem:[#allocation4] sm:$0xff] %vm268_vm1, %v840_v16 }
  0x27   : > { %636 = vmatpush.msra.mxu1 %v282_v2  ;;  %638 = vmatpush.msra.mxu3 %v282_v2  ;;  %274 = vst.msk [vmem:[#allocation4 + $0x8] sm:$0xff] %vm268_vm1, %v840_v16 }
  0x28   : > { %313 = vmatpush.msra.mxu0 %v281_v3  ;;  %640 = vmatpush.msra.mxu2 %v281_v3  ;;  %275 = vst.msk [vmem:[#allocation4 + $0x10] sm:$0xff] %vm268_vm1, %v840_v16 }
  0x29   : > { %621 = vmatmul.msk.f32.vlgmr.msra.gmra.mxu0 %vm285_vm0, %v277_v4  ;;  %623 = vmatmul.msk.f32.vlgmr.msra.gmra.mxu2 %vm285_vm0, %v279_v5  ;;  %276 = vst.msk [vmem:[#allocation4 + $0x18] sm:$0xff] %vm268_vm1, %v840_v16  ;;  %v333_v17 = vld [vmem:[#allocation3] sm:$0xff] }
  0x2a   : > { %639 = vmatpush.msra.mxu1 %v281_v3  ;;  %641 = vmatpush.msra.mxu3 %v281_v3  ;;  %v334_v25 = vld [vmem:[#allocation3 + $0x8] sm:$0xff] }
  0x2b   : > { %622 = vmatmul.msk.f32.vlgmr.msra.gmra.mxu1 %vm285_vm0, %v278_v6  ;;  %624 = vmatmul.msk.f32.vlgmr.msra.gmra.mxu3 %vm285_vm0, %v280_v7  ;;  %v335_v23 = vld [vmem:[#allocation3 + $0x10] sm:$0xff] }
  0x2c   : > { %v336_v32 = vld [vmem:[#allocation3 + $0x18] sm:$0xff] }
  0x2d   : > { %v354_v19 = vld [vmem:[#allocation4] sm:$0xff] }
  0x2e   : > { %v355_v28 = vld [vmem:[#allocation4 + $0x8] sm:$0xff] }
  0x2f   : > { %v356_v34 = vld [vmem:[#allocation4 + $0x10] sm:$0xff] }
  0x30   : > { %v357_v38 = vld [vmem:[#allocation4 + $0x18] sm:$0xff] }
  0xa6   : > { %v315_v8 = vpop.f32.mrf.mxu0 }
  0xa7   : > { %329 = vst [vmem:[#allocation2 + $0x10] sm:$0xff] %v315_v8  ;;  %337 = vadd.xlane.f32.xlu0 %v315_v8  ;;  %v358_v9 = vmul.f32 %v315_v8, %v315_v8 }
  0xa8   : > { %v318_v10 = vpop.f32.mrf.mxu1 }
  0xa9   : > { %330 = vst [vmem:[#allocation2] sm:$0xff] %v318_v10  ;;  %362 = vadd.xlane.f32.xlu2 %v358_v9  ;;  %v359_v12 = vmul.f32 %v318_v10, %v318_v10 }
  0xac   : > { %v321_v11 = vpop.f32.mrf.mxu2 }
  0xad   : > { %331 = vst [vmem:[#allocation2 + $0x18] sm:$0xff] %v321_v11  ;;  %341 = vadd.xlane.f32.xlu1 %v321_v11  ;;  %v360_v14 = vmul.f32 %v321_v11, %v321_v11 }
  0xae   : > { %v324_v13 = vpop.f32.mrf.mxu3 }
  0xaf   : > { %339 = vadd.xlane.f32.xlu0 %v318_v10  ;;  %332 = vst [vmem:[#allocation2 + $0x8] sm:$0xff] %v324_v13  ;;  %v361_v15 = vmul.f32 %v324_v13, %v324_v13 }
  0xb1   : > { %364 = vadd.xlane.f32.xlu2 %v359_v12 }
  0xb5   : > { %343 = vadd.xlane.f32.xlu1 %v324_v13 }
  0xb7   : > { %366 = vadd.xlane.f32.xlu0 %v360_v14 }
  0xbd   : > { %368 = vadd.xlane.f32.xlu1 %v361_v15 }
 0x11a   : > { %v338_v18 = vpop.xlane.xlu0 %337 }
 0x11b   : > { %v345_v20 = vadd.f32 %v338_v18, %v333_v17 }
 0x11c   : > { %v363_v21 = vpop.xlane.xlu2 %362 }
 0x11d   : > { %350 = vst.msk [vmem:[#allocation3] sm:$0xff] %vm268_vm1, %v345_v20  ;;  %v370_v22 = vadd.f32 %v363_v21, %v354_v19 }
 0x11f   : > { %374 = vst.msk [vmem:[#allocation4] sm:$0xff] %vm268_vm1, %v370_v22 }
 0x120   : > { %v342_v24 = vpop.xlane.xlu1 %341 }
 0x121   : > { %v347_v26 = vadd.f32 %v342_v24, %v335_v23 }
 0x122   : > { %v340_v27 = vpop.xlane.xlu0 %339 }
 0x123   : > { %352 = vst.msk [vmem:[#allocation3 + $0x10] sm:$0xff] %vm268_vm1, %v347_v26  ;;  %v346_v29 = vadd.f32 %v340_v27, %v334_v25 }
 0x124   : > { %v365_v30 = vpop.xlane.xlu2 %364 }
 0x125   : > { %351 = vst.msk [vmem:[#allocation3 + $0x8] sm:$0xff] %vm268_vm1, %v346_v29  ;;  %v371_v31 = vadd.f32 %v365_v30, %v355_v28 }
 0x127   : > { %375 = vst.msk [vmem:[#allocation4 + $0x8] sm:$0xff] %vm268_vm1, %v371_v31 }
 0x128   : > { %v344_v33 = vpop.xlane.xlu1 %343 }
 0x129   : > { %v348_v35 = vadd.f32 %v344_v33, %v336_v32 }
 0x12a   : > { %v367_v36 = vpop.xlane.xlu0 %366 }
 0x12b   : > { %353 = vst.msk [vmem:[#allocation3 + $0x18] sm:$0xff] %vm268_vm1, %v348_v35  ;;  %v372_v37 = vadd.f32 %v367_v36, %v356_v34 }
 0x12d   : > { %376 = vst.msk [vmem:[#allocation4 + $0x10] sm:$0xff] %vm268_vm1, %v372_v37 }
 0x130   : > { %v369_v39 = vpop.xlane.xlu1 %368 }
 0x131   : > { %v373_v40 = vadd.f32 %v369_v39, %v357_v38 }
 0x133   : > { %377 = vst.msk [vmem:[#allocation4 + $0x18] sm:$0xff] %vm268_vm1, %v373_v40 }
 0x134 PF: > { %p625_p12 = scmp.ne.s32.totalorder %s826_s15, 1 }
 0x136   : > { %381 = sbr.rel (%p625_p12) target bundleno = 495 (0x1ef), region = 56 }
 0x13b   : > { %v386_v41 = vld [vmem:[#allocation3] sm:$0xff]  ;;  %v388_v43 = vld [vmem:[#allocation3 + $0x8] sm:$0xff]  ;;  %v841_v44 = vmov 0   ;;  %v392_v47 = vld [vmem:[#allocation3 + $0x10] sm:$0xff]  ;;  %vm420_vm5 = vcmask 7168  }
 0x13c   : > { %v387_v42 = vld [vmem:[#allocation4] sm:$0xff]  ;;  %708 = vset.pattern.permute.xlu1 %v841_v44  ;;  %707 = vset.pattern.permute.xlu0 %v841_v44  ;;  %v389_v45 = vadd.f32 %v388_v43, %v386_v41  ;;  %v390_v46 = vld [vmem:[#allocation4 + $0x8] sm:$0xff]  ;;  %v394_v48 = vld [vmem:[#allocation4 + $0x10] sm:$0xff] }
 0x13d   : > { %v391_v49 = vadd.f32 %v390_v46, %v387_v42  ;;  %v396_v50 = vld [vmem:[#allocation3 + $0x18] sm:$0xff]  ;;  %709 = vset.pattern.permute.xlu2 %v841_v44  ;;  %v404_v2 = vld [vmem:[%s969_s2] sm:$0xff]  ;;  %v431_v17 = vld [vmem:[#allocation2 + $0x10] sm:$0xff] }
 0x13e   : > { %v393_v51 = vadd.f32 %v392_v47, %v389_v45  ;;  %v398_v52 = vld [vmem:[#allocation4 + $0x18] sm:$0xff]  ;;  %v417_v6 = vld [vmem:[%s970_s3] sm:$0xff]  ;;  %v434_v29 = vld [vmem:[#allocation2 + $0x8] sm:$0xff] }
 0x13f   : > { %v395_v53 = vadd.f32 %v394_v48, %v391_v49  ;;  %v432_v24 = vld [vmem:[#allocation2] sm:$0xff]  ;;  %v433_v31 = vld [vmem:[#allocation2 + $0x18] sm:$0xff] }
 0x140   : > { %v397_v54 = vadd.f32 %v396_v50, %v393_v51 }
 0x141   : > { %v399_v55 = vadd.f32 %v398_v52, %v395_v53 }
 0x142   : > { %v400_v56 = vmul.f32 0.001953125, %v397_v54 }
 0x143   : > { %v401_v57 = vmul.f32 0.001953125, %v399_v55 }
 0x144   : > { %v402_v58 = vmul.f32 %v400_v56, %v400_v56 }
 0x146   : > { %v403_v59 = vsub.f32 %v401_v57, %v402_v58 }
 0x148   : > { %v405_v60 = vadd.f32 1e-05, %v403_v59 }
 0x14a   : > { %710 = vrsqrt.f32 %v405_v60  ;;  %vm412_vm2 = vweird.f32 %v405_v60 }
 0x150   : > { %v711_v61 = vpop.eup %710 }
 0x151   : > { %v407_v62 = vmul.f32 %v711_v61, %v405_v60  ;;  %vm413_vm3 = vweird.f32 %v711_v61 }
 0x152   : > { %vm414_vm4 = vmor %vm412_vm2, %vm413_vm3 }
 0x153   : > { %v408_v63 = vmul.f32 %v711_v61, %v407_v62 }
 0x155   : > { %v409_v0 = vmul.f32 0.5, %v408_v63 }
 0x157   : > { %v410_v1 = vsub.f32 1.5, %v409_v0 }
 0x159   : > { %v411_v3 = vmul.f32 %v711_v61, %v410_v1 }
 0x15b   : > { %v415_v4 = vsel %vm414_vm4, %v711_v61, %v411_v3 }
 0x15c   : > { %v416_v5 = vmul.f32 %v415_v4, %v404_v2 }
 0x15e   : > { %423 = vst.msk [vmem:[#allocation5 + $0x10] sm:$0xff] %vm420_vm5, %v416_v5  ;;  %v418_v7 = vmul.f32 %v416_v5, %v400_v56 }
 0x15f   : > { %421 = vst.msk [vmem:[#allocation5] sm:$0xff] %vm420_vm5, %v416_v5 }
 0x160   : > { %422 = vst.msk [vmem:[#allocation5 + $0x8] sm:$0xff] %vm420_vm5, %v416_v5  ;;  %v419_v8 = vsub.f32 %v417_v6, %v418_v7 }
 0x161   : > { %424 = vst.msk [vmem:[#allocation5 + $0x18] sm:$0xff] %vm420_vm5, %v416_v5 }
 0x162   : > { %428 = vst.msk [vmem:[#allocation6 + $0x18] sm:$0xff] %vm420_vm5, %v419_v8 }
 0x163   : > { %425 = vst.msk [vmem:[#allocation6] sm:$0xff] %vm420_vm5, %v419_v8 }
 0x164   : > { %426 = vst.msk [vmem:[#allocation6 + $0x8] sm:$0xff] %vm420_vm5, %v419_v8 }
 0x165   : > { %v437_v9 = vld [vmem:[#allocation5 + $0x10] sm:$0xff]  ;;  %427 = vst.msk [vmem:[#allocation6 + $0x10] sm:$0xff] %vm420_vm5, %v419_v8 }
 0x166   : > { %451 = vperm.xlu1 %708, %v437_v9   ;;  %v435_v10 = vld [vmem:[#allocation5] sm:$0xff] }
 0x167   : > { %441 = vperm.xlu0 %707, %v435_v10   ;;  %v436_v13 = vld [vmem:[#allocation5 + $0x8] sm:$0xff] }
 0x168   : > { %v438_v12 = vld [vmem:[#allocation5 + $0x18] sm:$0xff] }
 0x169   : > { %v466_v15 = vld [vmem:[#allocation6 + $0x18] sm:$0xff] }
 0x16a   : > { %v463_v11 = vld [vmem:[#allocation6] sm:$0xff] }
 0x16b   : > { %469 = vperm.xlu2 %709, %v463_v11   ;;  %v464_v14 = vld [vmem:[#allocation6 + $0x8] sm:$0xff] }
 0x16c   : > { %v465_v16 = vld [vmem:[#allocation6 + $0x10] sm:$0xff] }
 0x16e   : > { %456 = vperm.xlu1 %708, %v438_v12  }
 0x16f   : > { %446 = vperm.xlu0 %707, %v436_v13  }
 0x173   : > { %474 = vperm.xlu2 %709, %v464_v14  }
 0x176   : > { %484 = vperm.xlu1 %708, %v466_v15  }
 0x177   : > { %479 = vperm.xlu0 %707, %v465_v16  }
 0x1c5   : > { %v470_v20 = vpop.permute.xlu2 %469 }
 0x1cd   : > { %v475_v28 = vpop.permute.xlu2 %474 }
 0x1d8   : > { %v452_v18 = vpop.permute.xlu1 %451 }
 0x1d9   : > { %v442_v19 = vpop.permute.xlu0 %441  ;;  %v461_v34 = vmul.f32 %v452_v18, %v433_v31 }
 0x1da   : > { %v459_v21 = vmul.f32 %v442_v19, %v431_v17 }
 0x1dc   : > { %v487_v22 = vadd.f32 %v470_v20, %v459_v21 }
 0x1de   : > { %v491_v23 = vmax.f32 %v487_v22, 0.0 }
 0x1e0   : > { %495 = vst [vmem:[#allocation12] sm:$0xff] %v491_v23  ;;  %v457_v25 = vpop.permute.xlu1 %456 }
 0x1e1   : > { %v447_v26 = vpop.permute.xlu0 %446  ;;  %v462_v33 = vmul.f32 %v457_v25, %v434_v29 }
 0x1e2   : > { %v460_v27 = vmul.f32 %v447_v26, %v432_v24 }
 0x1e4   : > { %v488_v30 = vadd.f32 %v475_v28, %v460_v27 }
 0x1e6   : > { %v492_v32 = vmax.f32 %v488_v30, 0.0 }
 0x1e8   : > { %496 = vst [vmem:[#allocation12 + $0x8] sm:$0xff] %v492_v32  ;;  %v485_v35 = vpop.permute.xlu1 %484 }
 0x1e9   : > { %v490_v36 = vadd.f32 %v485_v35, %v462_v33  ;;  %v480_v37 = vpop.permute.xlu0 %479 }
 0x1ea   : > { %v489_v38 = vadd.f32 %v480_v37, %v461_v34 }
 0x1eb   : > { %v494_v39 = vmax.f32 %v490_v36, 0.0 }
 0x1ec   : > { %v493_v40 = vmax.f32 %v489_v38, 0.0 }
 0x1ed   : > { %498 = vst [vmem:[#allocation12 + $0x18] sm:$0xff] %v494_v39 }
 0x1ee   : > { %497 = vst [vmem:[#allocation12 + $0x10] sm:$0xff] %v493_v40 }
 0x1ef PF: > { %p671_p13 = scmp.eq.s32.totalorder %s611_s18, 1  ;;  %s515_s15 = sshll.u32 %s971_s4, 4  ;;  %s516_s15 = int_to_ptr.hbm [resolvable:$true] %s515_s15 }
 0x1f0   : > { %s842_s21 = smov [#allocation12]   ;;  %s843_s23 = smov 128  }
 0x1f1   : > { %s513_s22 = sshll.u32 %s842_s21, 4  ;;  %s844_s24 = smov 8   ;;  %s514_s22 = int_to_ptr.vmem [resolvable:$true] %s513_s22 }
 0x1f2   : > { %651 = dma.vmem_to_hbm [thread:$0]  (%p671_p13), %s514_s22, 512, %s516_s15, [#allocation9], %s843_s23, %s843_s23, %s844_s24  }
 0x1f3 PF: > { %p673_p0 = scmp.eq.s32.totalorder %s612_s19, 1 }
 0x1f5   : > { %p663_p1 = pnand %p673_p0, %p615_p7 }
 0x1f7   : > { %p664_p2 = pneg %p663_p1 }
 0x1f9   : > { %821 = dma.done.wait (%p664_p2), [#allocation9], 512  }
 0x1fa   : > { %823 = vsyncadd (%p664_p2), [#allocation9], 4294966784  ;;  %s21_s17 = sadd.s32 1, %s834_s17   ;;  %s974_s15 = smov %s830_s16 }
 0x1fb   : > { %p18_p3 = scmp.ge.s32.totalorder %s21_s17, 4   ;;  %s975_s16 = smov %s977_s20 }
 0x1fd   :  { %20 = sbr.rel (!%p18_p3) target bundleno = 6 (0x6), region = 103 }
 0x202   :  { %537 = vsyncpa [#allocation8], 1 }
 0x203   :  { %539 = vsyncpa [#allocation8 + $0x1], 1 }
 0x204   :  { %540 = vsyncpa [#allocation11], 1 }
 0x205   :  { %541 = vsyncpa [#allocation9], 1 }
 0x206   :  { %543 = vsyncpa [#allocation9 + $0x1], 1 }

</bundles_post_ra>
